<compile_context>
chip_gen: v7x
topology: tpu7x:2x2x1
jax: 0.10.0
libtpu: 0.0.40
codegen_flags: <defaults>
</compile_context>

<pallas_src>
import math

import jax
import jax.numpy as jnp
from jax.experimental import pallas as pl
from jax.experimental.pallas import tpu as pltpu


# --- tuning knobs -----------------------------------------------------------
_SMALL_BYPASS_BYTES = 1 << 20   # below 1 MiB a kernel launch is pure overhead
_MAX_BLOCK_BYTES = 2 << 20      # ~2 MiB/block; x4 (in+out, double-buffered) = 8 MiB
_VMEM_LIMIT_BYTES = 32 << 20    # safe on v5e/v6e (128 MiB) and v7x (64 MiB physical)


def _copy_kernel(x_ref, o_ref):
    # Pure data movement; the flat element order is preserved, which is
    # exactly the semantics of a contiguous .view().
    o_ref[...] = x_ref[...]


def _resolve_shape(shape, total):
    shape = list(shape)
    if -1 in shape:
        idx = shape.index(-1)
        rest = 1
        for i, s in enumerate(shape):
            if i != idx:
                rest *= s
        assert rest > 0 and total % rest == 0, "cannot infer -1 dimension"
        shape[idx] = total // rest
    assert math.prod(shape) == total, "reshape size mismatch"
    return tuple(shape)


def _pick_cols(total, sublane_mult):
    """Widest lane-dense (multiple-of-128) last dim that divides the element
    count, preferring choices that keep the row count sublane-packed."""
    candidates = (4096, 2048, 1024, 512, 256, 128)
    for c in candidates:                       # sublane-packed rows first
        if total % (c * sublane_mult) == 0:
            return c
    for c in candidates:                       # any legal lane-dense split
        if total % c == 0:
            return c
    return None


def _pick_block_rows(rows, cols, itemsize, sublane_mult, max_block_bytes):
    """Largest legal block row-count (divisor of rows, sublane-packed or the
    full extent) that fits the per-block byte budget; prefers >=2 grid steps
    so both TensorCores on v7x get work."""
    row_bytes = cols * itemsize
    if rows <= sublane_mult and rows * row_bytes <= max_block_bytes:
        return rows
    divs = set()
    i = 1
    while i * i <= rows:
        if rows % i == 0:
            divs.add(i)
            divs.add(rows // i)
        i += 1
    best_multi = None   # >= 2 grid steps
    best_any = None
    for b in sorted(divs):
        legal = (b % sublane_mult == 0) or (b == rows)
        if not legal or b * row_bytes > max_block_bytes:
            continue
        best_any = b
        if rows // b >= 2:
            best_multi = b
    return best_multi if best_multi is not None else best_any


def pallas_reshape(x, shape, *, force_kernel=False):
    """Equivalent of torch `x.view(*shape)` (contiguous view)."""
    total = x.size
    target = _resolve_shape(shape, total)
    itemsize = jnp.dtype(x.dtype).itemsize
    total_bytes = total * itemsize

    # Fast path: a contiguous view is metadata-only — take it for free when
    # the input is small or cannot be laid out as a lane-aligned slab.
    if total % 128 != 0:
        return x.reshape(target)
    if not force_kernel and total_bytes < _SMALL_BYPASS_BYTES:
        return x.reshape(target)

    # Dtype-aware packed sublane count: 8 for f32, 16 for bf16, 32 for int8/fp8.
    sublane_mult = max(8, 8 * (4 // max(itemsize, 1)))

    cols = _pick_cols(total, sublane_mult)
    if cols is None:
        return x.reshape(target)
    rows = total // cols
    block_rows = _pick_block_rows(rows, cols, itemsize, sublane_mult,
                                  _MAX_BLOCK_BYTES)
    if block_rows is None:
        # Pathological factorization (e.g. huge prime row count) — the only
        # legal block would blow VMEM, so take the free metadata reshape.
        return x.reshape(target)

    x2 = x.reshape(rows, cols)
    grid = (rows // block_rows,)

    out2 = pl.pallas_call(
        _copy_kernel,
        out_shape=jax.ShapeDtypeStruct((rows, cols), x.dtype),
        grid_spec=pltpu.PrefetchScalarGridSpec(
            num_scalar_prefetch=0,
            grid=grid,
            in_specs=[pl.BlockSpec((block_rows, cols), lambda i: (i, 0))],
            out_specs=pl.BlockSpec((block_rows, cols), lambda i: (i, 0)),
        ),
        # A contiguous reshape never needs a second HBM buffer: let XLA alias
        # the output onto the input allocation when the input is donatable.
        input_output_aliases={0: 0},
        compiler_params=pltpu.CompilerParams(
            dimension_semantics=("parallel",),
            vmem_limit_bytes=_VMEM_LIMIT_BYTES,
        ),
        cost_estimate=pl.CostEstimate(
            flops=0, transcendentals=0, bytes_accessed=2 * total_bytes
        ),
    )(x2)

    # Metadata-only reshape to the requested target shape.
    return out2.reshape(target)


class Reshape:
    """Mirror of the PyTorch module: holds the target shape, forward = view."""

    def __init__(self, shape, force_kernel=False):
        self.shape = tuple(shape)
        self.force_kernel = force_kernel

    def __call__(self, x):
        return pallas_reshape(x, self.shape, force_kernel=self.force_kernel)


if __name__ == "__main__":
    # Typical decoder usage: flat latent (N, C*H*W) -> NCHW feature map.
    key = jax.random.PRNGKey(0)
    N, C, H, W = 2, 4, 16, 16
    x = jax.random.normal(key, (N, C * H * W), dtype=jnp.float32)

    # Reference: plain JAX reshape (same semantics as torch .view on contiguous).
    y_ref = x.reshape(N, C, H, W)

    # Force the Pallas copy kernel so it is actually exercised at demo size.
    module = Reshape((-1, C, H, W), force_kernel=True)
    y = jax.block_until_ready(module(x))
    assert y.shape == (N, C, H, W), y.shape
    assert y.dtype == x.dtype
    assert jnp.array_equal(y, y_ref), "kernel path mismatch vs reference"

    # Default path: small inputs bypass the kernel (metadata-only reshape).
    y_fast = jax.block_until_ready(Reshape((-1, C, H, W))(x))
    assert jnp.array_equal(y_fast, y_ref), "bypass path mismatch vs reference"

    print("KERNEL_OK")
</pallas_src>

<mosaic_0001>
module attributes {stable_mosaic.version = 11 : i64} {
  func.func @_copy_kernel(%arg0: i32, %arg1: memref<8x256xf32, #tpu.memory_space<vmem>>, %arg2: memref<8x256xf32, #tpu.memory_space<vmem>>) attributes {dimension_semantics = [#tpu.dimension_semantics<parallel>], iteration_bounds = array<i64: 1>, scalar_prefetch = 0 : i64, scratch_operands = 0 : i64, tpu.core_type = #tpu.core_type<tc>, window_params = [{transform_indices = @transform_0, window_bounds = array<i64: 8, 256>}, {transform_indices = @transform_1, window_bounds = array<i64: 8, 256>}]} {
    %c0 = arith.constant 0 : index
    %c0_0 = arith.constant 0 : index
    %0 = vector.load %arg1[%c0, %c0_0] : memref<8x256xf32, #tpu.memory_space<vmem>>, vector<8x256xf32>
    %c0_1 = arith.constant 0 : index
    %c0_2 = arith.constant 0 : index
    %1 = vector.load %arg2[%c0_1, %c0_2] : memref<8x256xf32, #tpu.memory_space<vmem>>, vector<8x256xf32>
    tpu.vector_store %arg2[%c0_1, %c0_2], %0 {strides = array<i32>} : memref<8x256xf32, #tpu.memory_space<vmem>>, vector<8x256xf32>,
    return
  }
  func.func @transform_0(%arg0: i32) -> (i32, i32) {
    %c0_i32 = arith.constant 0 : i32
    %c0_i32_0 = arith.constant 0 : i32
    return %arg0, %c0_i32 : i32, i32
  }
  func.func @transform_1(%arg0: i32) -> (i32, i32) {
    %c0_i32 = arith.constant 0 : i32
    %c0_i32_0 = arith.constant 0 : i32
    return %arg0, %c0_i32 : i32, i32
  }
}

</mosaic_0001>

<bundles_post_ra>
// kernel: tpu_custom_call.1
= control target key start
LH: loop header
LB: loop body
LE: loop exit
PB: predicated region body
PF: predicated region fallthrough
CT: control target
= control target key end

     0   :  { %6 = vsyncpa [#allocation3], 0  ;;  %s126_s0 = inlined_call_operand.hbm [shape: f32[8,256], index: 0, kind: input, shape index: {}, may-alias: {0,1}]   ;;  %s127_s1 = inlined_call_operand.hbm [shape: f32[8,256], index: 1, kind: output, shape index: {}, may-alias: {0,1}]  }
   0x1   :  { %7 = vsyncpa [#allocation4], 0  ;;  %s90_s6 = smov [#allocation2]   ;;  %s42_s10 = scalar_lea.hbm %s126_s0, 256 }
   0x2   :  { %s14_s7 = sshll.u32 %s90_s6, 4  ;;  %p43_p0 = scmp.ne.s32.totalorder %s126_s0, %s42_s10  ;;  %s15_s7 = int_to_ptr.vmem [resolvable:$true] %s14_s7 }
   0x3   :  { %p46_p1 = scmp.lt.u32.totalorder %s42_s10, %s126_s0 }
   0x5   :  { %p48_p2 = pnand %p46_p1, %p43_p0 }
   0x7   :  { %51 = shalt.err (!%p48_p2)
}
   0x8   :  { %s52_s15 = scalar_lea.vmem %s15_s7, 256  ;;  %p57_p4 = scmp.lt.s32.totalorder %s15_s7, %s15_s7 }
   0x9   :  { %p53_p3 = scmp.ne.s32.totalorder %s15_s7, %s52_s15  ;;  %p58_p5 = scmp.lt.s32.totalorder %s52_s15, %s52_s15 }
   0xb   :  { %p59_p6 = por %p58_p5, %p57_p4 }
   0xd   :  { %p60_p7 = pnand %p59_p6, %p53_p3 }
   0xf   :  { %63 = shalt.err (!%p60_p7)
}
  0x10   :  { %17 = dma.hbm_to_vmem [thread:$0]  %s126_s0, 256, %s15_s7, [#allocation3]  }
  0x11   :  { %86 = dma.done.wait [#allocation3], 256  }
  0x12   :  { %87 = vsyncadd [#allocation3], 4294967040  ;;  %s91_s18 = smov [#allocation5]   ;;  %v21_v0 = vld [vmem:[#allocation2] sm:$0xff]  ;;  %v22_v1 = vld [vmem:[#allocation2 + $0x8] sm:$0xff] }
  0x13   :  { %s31_s19 = sshll.u32 %s91_s18, 4  ;;  %23 = vst [vmem:[#allocation5] sm:$0xff] %v21_v0  ;;  %24 = vst [vmem:[#allocation5 + $0x8] sm:$0xff] %v22_v1  ;;  %s32_s19 = int_to_ptr.vmem [resolvable:$true] %s31_s19 }
  0x14   :  { %s64_s20 = scalar_lea.vmem %s32_s19, 256  ;;  %p69_p9 = scmp.lt.s32.totalorder %s32_s19, %s32_s19 }
  0x15   :  { %p65_p8 = scmp.ne.s32.totalorder %s32_s19, %s64_s20  ;;  %p70_p10 = scmp.lt.s32.totalorder %s64_s20, %s64_s20 }
  0x17   :  { %p71_p11 = por %p70_p10, %p69_p9 }
  0x19   :  { %p72_p12 = pnand %p71_p11, %p65_p8 }
  0x1b   :  { %75 = shalt.err (!%p72_p12)
}
  0x1c   :  { %s76_s0 = scalar_lea.hbm %s127_s1, 256 }
  0x1d   :  { %p77_p13 = scmp.ne.s32.totalorder %s127_s1, %s76_s0  ;;  %p80_p0 = scmp.lt.u32.totalorder %s76_s0, %s127_s1 }
  0x1f   :  { %p82_p1 = pnand %p80_p0, %p77_p13 }
  0x21   :  { %85 = shalt.err (!%p82_p1)
}
  0x22   :  { %34 = dma.vmem_to_hbm [thread:$0]  %s32_s19, 256, %s127_s1, [#allocation4]  }
  0x23   :  { %88 = dma.done.wait [#allocation4], 256  }
  0x24   :  { %89 = vsyncadd [#allocation4], 4294967040 }
  0x25   :  { %38 = vsyncpa [#allocation3], 1 }
  0x26   :  { %39 = vsyncpa [#allocation4], 1 }

</bundles_post_ra>
